<compile_context>
chip_gen: v6e
topology: v6e:2x2x1
jax: 0.10.0
libtpu: 0.0.40
codegen_flags: <defaults>
</compile_context>

<pallas_src>
import jax
import jax.numpy as jnp
from jax.experimental import pallas as pl
from jax.experimental.pallas import tpu as pltpu


def _numerical_embedder_kernel(x_ref, sel_ref, w_ref, b_ref, o_ref):
    # x_ref:   (TB, N)    batch tile of raw numerical features
    # sel_ref: (N, N*D)   constant 0/1 selection matrix (resident in VMEM)
    # w_ref:   (1, N*D)   flattened weights (resident)
    # b_ref:   (1, N*D)   flattened biases  (resident)
    # o_ref:   (TB, N*D)  lane-dense flattened output tile
    x = x_ref[...]
    # Expand x[b, n] -> x_exp[b, n*D + d] with a tiny matmul against the 0/1
    # selection matrix. HIGHEST precision keeps this exact in f32 and we avoid
    # any in-kernel reshape or cross-lane gather.
    x_exp = jnp.dot(
        x,
        sel_ref[...],
        preferred_element_type=jnp.float32,
        precision=jax.lax.Precision.HIGHEST,
    )
    out = x_exp * w_ref[...] + b_ref[...]   # pure VPU multiply-add
    o_ref[...] = out.astype(o_ref.dtype)


def numerical_embedder(x, weights, biases, *, block_b=1024, out_dtype=None):
    """x: (B, N); weights/biases: (N, D)  ->  (B, N, D)."""
    B, N = x.shape
    N2, D = weights.shape
    assert N == N2 and biases.shape == (N, D)
    ND = N * D
    # Pass out_dtype=jnp.bfloat16 to halve HBM write traffic if the consumer
    # tolerates it; default keeps exact f32 semantics of the PyTorch module.
    out_dtype = out_dtype or x.dtype

    # Batch tile: cap the double-buffered output tile at a few MiB of VMEM and
    # keep the sublane dim a multiple of 8 (or the full extent B).
    bytes_per_row = ND * jnp.dtype(out_dtype).itemsize
    max_rows = max(8, (4 * 1024 * 1024) // max(1, bytes_per_row))
    tb = min(block_b, max_rows)
    tb = max(8, (tb // 8) * 8)
    if B <= tb:
        tb = B  # single full-extent block

    x32 = x.astype(jnp.float32)
    w_flat = weights.reshape(1, ND).astype(jnp.float32)
    b_flat = biases.reshape(1, ND).astype(jnp.float32)
    # sel[n, n*D + d] = 1, else 0.  Small (N, N*D); built once, resident.
    sel = (
        jnp.arange(ND, dtype=jnp.int32)[None, :] // D
        == jnp.arange(N, dtype=jnp.int32)[:, None]
    ).astype(jnp.float32)

    out_flat = pl.pallas_call(
        _numerical_embedder_kernel,
        out_shape=jax.ShapeDtypeStruct((B, ND), out_dtype),
        grid=(pl.cdiv(B, tb),),
        in_specs=[
            pl.BlockSpec((tb, N), lambda i: (i, 0)),   # x: streamed per batch tile
            pl.BlockSpec((N, ND), lambda i: (0, 0)),   # selection matrix: resident
            pl.BlockSpec((1, ND), lambda i: (0, 0)),   # weights: resident
            pl.BlockSpec((1, ND), lambda i: (0, 0)),   # biases: resident
        ],
        out_specs=pl.BlockSpec((tb, ND), lambda i: (i, 0)),
        compiler_params=pltpu.CompilerParams(
            dimension_semantics=("parallel",),
            vmem_limit_bytes=32 * 1024 * 1024,
        ),
    )(x32, sel, w_flat, b_flat)

    return out_flat.reshape(B, N, D)


def _reference(x, weights, biases):
    return x[:, :, None] * weights[None, :, :] + biases[None, :, :]


if __name__ == "__main__":
    # Small shapes consistent with the module: batch=2, num_numerical_types=8, dim=32.
    B, N, D = 2, 8, 32

    key = jax.random.PRNGKey(0)
    kx, kw, kb = jax.random.split(key, 3)
    x = jax.random.normal(kx, (B, N), dtype=jnp.float32)
    weights = jax.random.normal(kw, (N, D), dtype=jnp.float32)
    biases = jax.random.normal(kb, (N, D), dtype=jnp.float32)

    out = numerical_embedder(x, weights, biases)
    out = jax.block_until_ready(out)
    ref = _reference(x, weights, biases)
    assert out.shape == (B, N, D)
    assert jnp.allclose(out, ref, atol=1e-6, rtol=1e-6)

    # Also exercise the multi-tile (pipelined) path, including a partial last block.
    B2 = 300
    kx2 = jax.random.fold_in(kx, 1)
    x2 = jax.random.normal(kx2, (B2, N), dtype=jnp.float32)
    out2 = jax.block_until_ready(numerical_embedder(x2, weights, biases, block_b=128))
    ref2 = _reference(x2, weights, biases)
    assert out2.shape == (B2, N, D)
    assert jnp.allclose(out2, ref2, atol=1e-6, rtol=1e-6)

    print("KERNEL_OK")
</pallas_src>

<mosaic_0001>
module attributes {stable_mosaic.version = 11 : i64} {
  func.func @_numerical_embedder_kernel(%arg0: i32, %arg1: memref<2x8xf32, #tpu.memory_space<vmem>>, %arg2: memref<8x256xf32, #tpu.memory_space<vmem>>, %arg3: memref<1x256xf32, #tpu.memory_space<vmem>>, %arg4: memref<1x256xf32, #tpu.memory_space<vmem>>, %arg5: memref<2x256xf32, #tpu.memory_space<vmem>>) attributes {dimension_semantics = [#tpu.dimension_semantics<parallel>], iteration_bounds = array<i64: 1>, scalar_prefetch = 0 : i64, scratch_operands = 0 : i64, tpu.core_type = #tpu.core_type<tc>, window_params = [{transform_indices = @transform_0, window_bounds = array<i64: 2, 8>}, {pipeline_mode = #tpu.pipeline_mode<synchronous>, transform_indices = @transform_1, window_bounds = array<i64: 8, 256>}, {pipeline_mode = #tpu.pipeline_mode<synchronous>, transform_indices = @transform_2, window_bounds = array<i64: 1, 256>}, {pipeline_mode = #tpu.pipeline_mode<synchronous>, transform_indices = @transform_3, window_bounds = array<i64: 1, 256>}, {transform_indices = @transform_4, window_bounds = array<i64: 2, 256>}]} {
    %c0 = arith.constant 0 : index
    %c0_0 = arith.constant 0 : index
    %0 = vector.load %arg1[%c0, %c0_0] : memref<2x8xf32, #tpu.memory_space<vmem>>, vector<2x8xf32>
    %c0_1 = arith.constant 0 : index
    %c0_2 = arith.constant 0 : index
    %1 = vector.load %arg2[%c0_1, %c0_2] : memref<8x256xf32, #tpu.memory_space<vmem>>, vector<8x256xf32>
    %cst = arith.constant dense<0.000000e+00> : vector<2x256xf32>
    %2 = tpu.matmul %0, %1, %cst {dimension_numbers = #tpu.dot_dimension_numbers<[1], [0], [0], [1], [0, 0, 1, 1], [], []>, precision = #tpu.contract_precision<fp32>} : vector<2x8xf32>, vector<8x256xf32>, vector<2x256xf32> -> vector<2x256xf32>
    %c0_3 = arith.constant 0 : index
    %c0_4 = arith.constant 0 : index
    %3 = vector.load %arg3[%c0_3, %c0_4] : memref<1x256xf32, #tpu.memory_space<vmem>>, vector<1x256xf32>
    %4 = vector.broadcast %3 : vector<1x256xf32> to vector<2x256xf32>
    %5 = arith.mulf %2, %4 : vector<2x256xf32>
    %c0_5 = arith.constant 0 : index
    %c0_6 = arith.constant 0 : index
    %6 = vector.load %arg4[%c0_5, %c0_6] : memref<1x256xf32, #tpu.memory_space<vmem>>, vector<1x256xf32>
    %7 = vector.broadcast %6 : vector<1x256xf32> to vector<2x256xf32>
    %8 = arith.addf %5, %7 : vector<2x256xf32>
    %c0_7 = arith.constant 0 : index
    %c0_8 = arith.constant 0 : index
    %9 = vector.load %arg5[%c0_7, %c0_8] : memref<2x256xf32, #tpu.memory_space<vmem>>, vector<2x256xf32>
    tpu.vector_store %arg5[%c0_7, %c0_8], %8 {strides = array<i32>} : memref<2x256xf32, #tpu.memory_space<vmem>>, vector<2x256xf32>,
    return
  }
  func.func @transform_0(%arg0: i32) -> (i32, i32) {
    %c0_i32 = arith.constant 0 : i32
    %c0_i32_0 = arith.constant 0 : i32
    return %arg0, %c0_i32 : i32, i32
  }
  func.func @transform_1(%arg0: i32) -> (i32, i32) {
    %c0_i32 = arith.constant 0 : i32
    %c0_i32_0 = arith.constant 0 : i32
    %c0_i32_1 = arith.constant 0 : i32
    return %c0_i32, %c0_i32_0 : i32, i32
  }
  func.func @transform_2(%arg0: i32) -> (i32, i32) {
    %c0_i32 = arith.constant 0 : i32
    %c0_i32_0 = arith.constant 0 : i32
    %c0_i32_1 = arith.constant 0 : i32
    return %c0_i32, %c0_i32_0 : i32, i32
  }
  func.func @transform_3(%arg0: i32) -> (i32, i32) {
    %c0_i32 = arith.constant 0 : i32
    %c0_i32_0 = arith.constant 0 : i32
    %c0_i32_1 = arith.constant 0 : i32
    return %c0_i32, %c0_i32_0 : i32, i32
  }
  func.func @transform_4(%arg0: i32) -> (i32, i32) {
    %c0_i32 = arith.constant 0 : i32
    %c0_i32_0 = arith.constant 0 : i32
    return %arg0, %c0_i32 : i32, i32
  }
}

</mosaic_0001>

<bundles_post_ra>
// kernel: tpu_custom_call.1
= control target key start
LH: loop header
LB: loop body
LE: loop exit
PB: predicated region body
PF: predicated region fallthrough
CT: control target
= control target key end

     0   :  { %9 = vsyncpa [#allocation3], 0  ;;  %s685_s0 = inlined_call_operand.hbm [shape: f32[2,8], index: 0, kind: input, shape index: {}]   ;;  %s686_s1 = inlined_call_operand.hbm [shape: f32[8,256], index: 1, kind: input, shape index: {}]   ;;  %s687_s2 = inlined_call_operand.vmem [shape: f32[1,256], index: 2, kind: input, shape index: {}]   ;;  %s688_s3 = inlined_call_operand.vmem [shape: f32[1,256], index: 3, kind: input, shape index: {}]   ;;  %s689_s4 = inlined_call_operand.hbm [shape: f32[2,256], index: 4, kind: output, shape index: {}]  }
   0x1   :  { %10 = vsyncpa [#allocation6], 0 }
   0x2   :  { %11 = vsyncpa [#allocation4], 0  ;;  %s641_s15 = smov [#allocation2]   ;;  %s642_s17 = smov [#allocation5]  }
   0x3   :  { %s18_s16 = sshll.u32 %s641_s15, 4  ;;  %s28_s18 = sshll.u32 %s642_s17, 4  ;;  %s19_s16 = int_to_ptr.vmem [resolvable:$true] %s18_s16  ;;  %s29_s18 = int_to_ptr.vmem [resolvable:$true] %s28_s18 }
   0x4   :  { %s583_s19 = scalar_lea.vmem %s19_s16, 32  ;;  %p588_p1 = scmp.lt.s32.totalorder %s19_s16, %s19_s16 }
   0x5   :  { %p584_p0 = scmp.ne.s32.totalorder %s19_s16, %s583_s19  ;;  %p589_p2 = scmp.lt.s32.totalorder %s583_s19, %s583_s19 }
   0x7   :  { %p590_p3 = por %p589_p2, %p588_p1 }
   0x9   :  { %p591_p4 = pnand %p590_p3, %p584_p0 }
   0xb   :  { %594 = shalt.err (!%p591_p4)
}
   0xc   :  { %21 = dma.hbm_to_vmem [thread:$0]  %s685_s0, 32, %s19_s16, [#allocation3]  }
   0xd   :  { %s603_s22 = scalar_lea.vmem %s29_s18, 256  ;;  %p608_p6 = scmp.lt.s32.totalorder %s29_s18, %s29_s18 }
   0xe   :  { %p604_p5 = scmp.ne.s32.totalorder %s29_s18, %s603_s22  ;;  %p609_p7 = scmp.lt.s32.totalorder %s603_s22, %s603_s22 }
  0x10   :  { %p610_p8 = por %p609_p7, %p608_p6 }
  0x12   :  { %p611_p9 = pnand %p610_p8, %p604_p5 }
  0x14   :  { %614 = shalt.err (!%p611_p9)
}
  0x15   :  { %31 = dma.hbm_to_vmem [thread:$0]  %s686_s1, 256, %s29_s18, [#allocation6]  }
  0x16   :  { %635 = dma.done.wait [#allocation3], 32  }
  0x17   :  { %636 = vsyncadd [#allocation3], 4294967264 }
  0x18   :  { %637 = dma.done.wait [#allocation6], 256  }
  0x19   :  { %638 = vsyncadd [#allocation6], 4294967040  ;;  %v643_v0 = vmov 0.0   ;;  %vm45_vm0 = vcmask 64512   ;;  %v44_v1 = vld [vmem:[#allocation5 + $0x8] sm:$0xff]  ;;  %v43_v2 = vld [vmem:[#allocation5] sm:$0xff]  ;;  %v516_v20 = vlaneseq }
  0x1a   :  { %115 = vmatprep.mubr.f32.mxu0 %v643_v0  ;;  %201 = vmatprep.mubr.f32.mxu1 %v643_v0  ;;  %v42_v3 = vld [vmem:[#allocation2] sm:$0x3]  ;;  %v79_v4 = vand.u32 4294901760, %v44_v1  ;;  %v81_v5 = vand.u32 4294901760, %v43_v2 }
  0x1b   :  { %v47_v6 = vsel %vm45_vm0, %v42_v3, 0  ;;  %v517_v23 = vshrl.u32 %v516_v20, 7  ;;  %v514_v33 = vld [vmem:[%s687_s2] sm:$0x3]  ;;  %s644_s2 = smov [#allocation7]  }
  0x1c   :  { %v116_v7 = vand.u32 4294901760, %v47_v6  ;;  %80 = vmatprep.subr.mxu0 %v79_v4  ;;  %v158_v8 = vsub.f32 %v44_v1, %v79_v4  ;;  %v164_v9 = vsub.f32 %v43_v2, %v81_v5  ;;  %v528_v43 = vld [vmem:[%s688_s3] sm:$0x3]  ;;  %s560_s27 = sshll.u32 %s644_s2, 4  ;;  %s561_s27 = int_to_ptr.vmem [resolvable:$true] %s560_s27 }
  0x1d   :  { %82 = vmatpush1.msra.mxu0 %v81_v5  ;;  %v518_v31 = vsub.s32 0, %v517_v23  ;;  %v522_v37 = vsub.s32 1, %v517_v23  ;;  %s615_s28 = scalar_lea.vmem %s561_s27, 64  ;;  %p620_p11 = scmp.lt.s32.totalorder %s561_s27, %s561_s27 }
  0x1e   :  { %v117_v10 = vsub.f32 %v47_v6, %v116_v7  ;;  %v159_v11 = vand.u32 4294901760, %v158_v8  ;;  %241 = vmatprep.subr.mxu0 %v158_v8  ;;  %v165_v12 = vand.u32 4294901760, %v164_v9  ;;  %p616_p10 = scmp.ne.s32.totalorder %s561_s27, %s615_s28  ;;  %p621_p12 = scmp.lt.s32.totalorder %s615_s28, %s615_s28 }
  0x1f   :  { %v519_v42 = vrot.slane %v514_v33, %v518_v31  ;;  %v523_v48 = vrot.slane %v514_v33, %v522_v37  ;;  %v533_v50 = vrot.slane %v528_v43, %v518_v31  ;;  %v537_v52 = vrot.slane %v528_v43, %v522_v37 }
  0x20   :  { %v118_v13 = vand.u32 4294901760, %v117_v10  ;;  %v160_v14 = vsub.f32 %v158_v8, %v159_v11  ;;  %v166_v15 = vsub.f32 %v164_v9, %v165_v12  ;;  %p622_p13 = por %p621_p12, %p620_p11 }
  0x22   :  { %v119_v16 = vsub.f32 %v117_v10, %v118_v13  ;;  %v161_v17 = vand.u32 4294901760, %v160_v14  ;;  %v167_v18 = vand.u32 4294901760, %v166_v15  ;;  %p623_p0 = pnand %p622_p13, %p616_p10 }
  0x24   :  { %v120_v19 = vand.u32 4294901760, %v119_v16  ;;  %162 = vmatprep.subr.mxu1 %v161_v17 }
  0x25   :  { %168 = vmatpush1.msra.mxu1 %v167_v18 }
  0x26   :  { %121 = vmatmul.mubr.f32.vlgmr.msra.gmra.mxu0 %v120_v19  ;;  %203 = vmatmul.mubr.f32.vlgmr.msra.gmra.mxu1 %v116_v7 }
  0x27   :  { %244 = vmatpush1.msra.mxu0 %v164_v9  ;;  %317 = vmatprep.subr.mxu1 %v79_v4 }
  0x28   :  { %277 = vmatprep.mubr.f32.mxu0 %v643_v0  ;;  %319 = vmatpush1.msra.mxu1 %v81_v5 }
  0x29   :  { %395 = vmatprep.subr.mxu0 %v159_v11  ;;  %352 = vmatprep.mubr.f32.mxu1 %v643_v0 }
  0x2a   :  { %280 = vmatmul.mubr.f32.vlgmr.msra.gmra.mxu0 %v117_v10  ;;  %356 = vmatmul.mubr.f32.vlgmr.msra.gmra.mxu1 %v118_v13 }
  0x2b   :  { %399 = vmatpush1.msra.mxu0 %v165_v12  ;;  %471 = vmatprep.subr.mxu1 %v79_v4 }
  0x2c   :  { %432 = vmatprep.mubr.f32.mxu0 %v643_v0  ;;  %473 = vmatpush1.msra.mxu1 %v81_v5 }
  0x2d   :  { %506 = vmatprep.mubr.f32.mxu1 %v643_v0 }
  0x2e   :  { %434 = vmatmul.mubr.f32.vlgmr.msra.gmra.mxu0 %v116_v7  ;;  %508 = vmatmul.mubr.f32.vlgmr.msra.gmra.mxu1 %v116_v7 }
  0xe6   :  { %v122_v21 = vpop.f32.mrf.mxu0  ;;  %v204_v22 = vpop.f32.mrf.mxu1 }
  0xe7   :  { %v205_v24 = vadd.f32 %v204_v22, %v122_v21 }
  0xe8   :  { %v124_v25 = vpop.f32.mrf.mxu0  ;;  %v206_v26 = vpop.f32.mrf.mxu1 }
  0xe9   :  { %v207_v27 = vadd.f32 %v206_v26, %v124_v25 }
  0xea   :  { %v281_v28 = vpop.f32.mrf.mxu0  ;;  %v357_v30 = vpop.f32.mrf.mxu1 }
  0xeb   :  { %v282_v29 = vadd.f32 %v281_v28, %v205_v24 }
  0xec   :  { %v283_v32 = vpop.f32.mrf.mxu0  ;;  %v359_v36 = vpop.f32.mrf.mxu1 }
  0xed   :  { %v358_v34 = vadd.f32 %v357_v30, %v282_v29  ;;  %v284_v35 = vadd.f32 %v283_v32, %v207_v27 }
  0xee   :  { %v435_v38 = vpop.f32.mrf.mxu0  ;;  %v509_v41 = vpop.f32.mrf.mxu1 }
  0xef   :  { %v360_v39 = vadd.f32 %v359_v36, %v284_v35  ;;  %v436_v40 = vadd.f32 %v435_v38, %v358_v34 }
  0xf0   :  { %v437_v44 = vpop.f32.mrf.mxu0  ;;  %v511_v47 = vpop.f32.mrf.mxu1 }
  0xf1   :  { %v510_v45 = vadd.f32 %v509_v41, %v436_v40  ;;  %v438_v46 = vadd.f32 %v437_v44, %v360_v39 }
  0xf3   :  { %v526_v49 = vmul.f32 %v519_v42, %v510_v45  ;;  %v512_v51 = vadd.f32 %v511_v47, %v438_v46 }
  0xf5   :  { %v527_v53 = vmul.f32 %v523_v48, %v512_v51  ;;  %v540_v54 = vadd.f32 %v533_v50, %v526_v49 }
  0xf7   :  { %v541_v55 = vadd.f32 %v537_v52, %v527_v53 }
  0xf9   :  { %v544_v56 = vcombine.low %v540_v54, %v541_v55 }
  0xfb   :  { %570 = vst.sshfl [vmem:[#allocation7] sm:$0x33 pattern:$0x76325410] %v544_v56 }
  0xfc   :  { %626 = shalt.err (!%p623_p0)
}
  0xfd   :  { %563 = dma.vmem_to_hbm [thread:$0]  %s561_s27, 64, %s689_s4, [#allocation4]  }
  0xfe   :  { %639 = dma.done.wait [#allocation4], 64  }
  0xff   :  { %640 = vsyncadd [#allocation4], 4294967232 }
 0x100   :  { %567 = vsyncpa [#allocation3], 1 }
 0x101   :  { %568 = vsyncpa [#allocation6], 1 }
 0x102   :  { %569 = vsyncpa [#allocation4], 1 }

</bundles_post_ra>
